<compile_context>
chip_gen: v6e
topology: v6e:2x2x1
jax: 0.10.0
libtpu: 0.0.40
codegen_flags: <defaults>
</compile_context>

<pallas_src>
import jax
import jax.numpy as jnp
from jax.experimental import pallas as pl
from jax.experimental.pallas import tpu as pltpu


def _round_up(x: int, m: int) -> int:
    return ((x + m - 1) // m) * m


def _sublane(dtype) -> int:
    # Minimum second-to-last-dim tile: 8 for 4-byte, 16 for 2-byte, 32 for 1-byte.
    return max(8, 32 // jnp.dtype(dtype).itemsize)


def _matmul_kernel_inplace(a_ref, b_ref, o_ref):
    # f32 output: accumulate directly into the K-resident output block.
    @pl.when(pl.program_id(3) == 0)
    def _():
        o_ref[...] = jnp.zeros_like(o_ref)

    o_ref[...] += jnp.dot(
        a_ref[...], b_ref[...], preferred_element_type=jnp.float32
    )


def _matmul_kernel_acc(a_ref, b_ref, o_ref, acc_ref):
    # Non-f32 output: accumulate in an f32 scratch, cast on the last K step.
    @pl.when(pl.program_id(3) == 0)
    def _():
        acc_ref[...] = jnp.zeros_like(acc_ref)

    acc_ref[...] += jnp.dot(
        a_ref[...], b_ref[...], preferred_element_type=jnp.float32
    )

    @pl.when(pl.program_id(3) == pl.num_programs(3) - 1)
    def _():
        o_ref[...] = acc_ref[...].astype(o_ref.dtype)


def pallas_matmul(A, B, *, tm: int = 512, tn: int = 512, tk: int = 1024,
                  cast_inputs_to_bf16: bool = False):
    """Batched matmul A @ B via a tiled Pallas TPU kernel.

    A: [batch, M, K], B: [batch, K, N] -> [batch, M, N]
    (2-D inputs are also accepted and handled as a single batch of 1.)
    `cast_inputs_to_bf16=True` enables the bf16 MXU fast path (f32 accumulate).
    """
    squeeze_out = False
    if A.ndim == 2 and B.ndim == 2:
        A = A[None]
        B = B[None]
        squeeze_out = True
    assert A.ndim == 3 and B.ndim == 3, "expected 2-D or 3-D operands"
    assert A.shape[0] == B.shape[0] and A.shape[2] == B.shape[1]
    # TODO(synk): torch-style broadcasting of mismatched batch dims (3-D @ 2-D)
    # is not implemented; equal batch dims (or 2-D @ 2-D) only.

    batch, M, K = A.shape
    N = B.shape[2]
    out_dtype = jnp.result_type(A.dtype, B.dtype)   # semantics of the module

    if cast_inputs_to_bf16:
        A = A.astype(jnp.bfloat16)
        B = B.astype(jnp.bfloat16)

    # ---- Tile sizes (dtype-aware sublane, lane-aligned) -------------------
    sub_m = max(_sublane(A.dtype), _sublane(out_dtype))
    tm_eff = min(tm, _round_up(M, sub_m))        # sublane-aligned rows
    tn_eff = min(tn, _round_up(N, 128))          # lane-aligned cols

    if K % 128 == 0:
        # Pick a tk that divides K exactly -> no K padding at all.
        tk_eff = min(tk, K)
        while K % tk_eff != 0:
            tk_eff -= 128
        Kp = K
    else:
        tk_eff = min(tk, _round_up(K, 128))
        Kp = _round_up(K, tk_eff)

    # Only the contraction dim needs zero padding for correctness; M/N edge
    # tiles are handled by Pallas (out-of-bounds output writes are dropped).
    if Kp != K:
        A = jnp.pad(A, ((0, 0), (0, 0), (0, Kp - K)))
        B = jnp.pad(B, ((0, 0), (0, Kp - K), (0, 0)))

    n_i = pl.cdiv(M, tm_eff)
    n_j = pl.cdiv(N, tn_eff)
    n_k = Kp // tk_eff
    grid = (batch, n_i, n_j, n_k)

    use_acc = jnp.dtype(out_dtype) != jnp.dtype(jnp.float32)
    kernel = _matmul_kernel_acc if use_acc else _matmul_kernel_inplace
    scratch_shapes = (
        [pltpu.VMEM((tm_eff, tn_eff), jnp.float32)] if use_acc else []
    )

    a_item = jnp.dtype(A.dtype).itemsize
    b_item = jnp.dtype(B.dtype).itemsize
    o_item = jnp.dtype(out_dtype).itemsize

    # VMEM footprint: double-buffered inputs + output block (+ f32 acc).
    footprint = (2 * tm_eff * tk_eff * a_item
                 + 2 * tk_eff * tn_eff * b_item
                 + 2 * tm_eff * tn_eff * o_item
                 + (tm_eff * tn_eff * 4 if use_acc else 0))
    # >= 32 MiB (past v5e's 16 MiB default scoped limit), <= 64 MiB (v7x
    # physical VMEM), 1.5x headroom for compiler scratch.
    vmem_limit = int(min(64 * 1024 * 1024,
                         max(32 * 1024 * 1024, footprint * 3 // 2)))

    # Truthful traffic estimate: A re-read n_j times, B re-read n_i times.
    cost = pl.CostEstimate(
        flops=2 * batch * M * N * Kp,
        transcendentals=0,
        bytes_accessed=batch * (n_j * M * Kp * a_item
                                + n_i * Kp * N * b_item
                                + M * N * o_item),
    )

    out = pl.pallas_call(
        kernel,
        out_shape=jax.ShapeDtypeStruct((batch, M, N), out_dtype),
        grid_spec=pltpu.PrefetchScalarGridSpec(
            num_scalar_prefetch=0,
            grid=grid,
            in_specs=[
                pl.BlockSpec((pl.Squeezed(), tm_eff, tk_eff),
                             lambda b, i, j, k: (b, i, k)),
                pl.BlockSpec((pl.Squeezed(), tk_eff, tn_eff),
                             lambda b, i, j, k: (b, k, j)),
            ],
            out_specs=pl.BlockSpec((pl.Squeezed(), tm_eff, tn_eff),
                                   lambda b, i, j, k: (b, i, j)),
            scratch_shapes=scratch_shapes,
        ),
        compiler_params=pltpu.CompilerParams(
            dimension_semantics=("parallel", "parallel", "parallel", "arbitrary"),
            vmem_limit_bytes=vmem_limit,
        ),
        cost_estimate=cost,
    )(A, B)

    if squeeze_out:
        out = out[0]
    return out


if __name__ == "__main__":
    key = jax.random.PRNGKey(0)
    k1, k2, k3, k4 = jax.random.split(key, 4)

    # Small shapes consistent with the module's forward (plain batched matmul):
    # A: [batch=2, seq=8, hidden=32], B: [batch=2, hidden=32, out=16]
    A = jax.random.normal(k1, (2, 8, 32), dtype=jnp.float32)
    B = jax.random.normal(k2, (2, 32, 16), dtype=jnp.float32)

    out = pallas_matmul(A, B)
    jax.block_until_ready(out)

    ref = jnp.matmul(A, B)
    assert out.shape == ref.shape
    assert jnp.allclose(out, ref, atol=1e-4, rtol=1e-4)

    # Larger check: multi-tile M/N with edge tiles (no wrapper padding) and a
    # multi-step K accumulation into the resident f32 output block.
    A2 = jax.random.normal(k3, (2, 640, 1536), dtype=jnp.float32)
    B2 = jax.random.normal(k4, (2, 1536, 384), dtype=jnp.float32)
    out2 = pallas_matmul(A2, B2, tm=512, tn=256, tk=512)
    jax.block_until_ready(out2)
    ref2 = jnp.matmul(A2, B2)
    assert out2.shape == ref2.shape
    rel_err = jnp.linalg.norm(out2 - ref2) / jnp.linalg.norm(ref2)
    assert rel_err < 1e-3, f"relative error too large: {rel_err}"

    # Optional bf16-input fast path (f32 accumulation) — looser tolerance.
    out3 = pallas_matmul(A2, B2, cast_inputs_to_bf16=True)
    jax.block_until_ready(out3)
    rel_err3 = jnp.linalg.norm(out3 - ref2) / jnp.linalg.norm(ref2)
    assert out3.shape == ref2.shape
    assert rel_err3 < 2e-2, f"bf16 path relative error too large: {rel_err3}"

    print("KERNEL_OK")
</pallas_src>

<mosaic_0001>
module attributes {stable_mosaic.version = 11 : i64} {
  func.func @_matmul_kernel_inplace(%arg0: i32, %arg1: i32, %arg2: i32, %arg3: i32, %arg4: memref<1x8x128xf32, #tpu.memory_space<vmem>>, %arg5: memref<1x128x128xf32, #tpu.memory_space<vmem>>, %arg6: memref<1x8x128xf32, #tpu.memory_space<vmem>>) attributes {dimension_semantics = [#tpu.dimension_semantics<parallel>, #tpu.dimension_semantics<parallel>, #tpu.dimension_semantics<parallel>, #tpu.dimension_semantics<arbitrary>], iteration_bounds = array<i64: 2, 1, 1, 1>, scalar_prefetch = 0 : i64, scratch_operands = 0 : i64, tpu.core_type = #tpu.core_type<tc>, window_params = [{transform_indices = @transform_0, window_bounds = array<i64: 1, 8, 128>}, {transform_indices = @transform_1, window_bounds = array<i64: 1, 128, 128>}, {transform_indices = @transform_2, window_bounds = array<i64: 1, 8, 128>}]} {
    %c0_i32 = arith.constant 0 : i32
    %0 = arith.cmpi eq, %arg3, %c0_i32 : i32
    %1 = arith.extui %0 : i1 to i32
    %c0_i32_0 = arith.constant 0 : i32
    %2 = arith.cmpi ne, %1, %c0_i32_0 : i32
    scf.if %2 {
      %cst_12 = arith.constant 0.000000e+00 : f32
      %14 = vector.broadcast %cst_12 : f32 to vector<8x128xf32>
      %c0_13 = arith.constant 0 : index
      %c0_14 = arith.constant 0 : index
      %c0_15 = arith.constant 0 : index
      %15 = vector.load %arg6[%c0_13, %c0_14, %c0_15] : memref<1x8x128xf32, #tpu.memory_space<vmem>>, vector<1x8x128xf32>
      %16 = vector.shape_cast %15 : vector<1x8x128xf32> to vector<8x128xf32>
      %17 = vector.shape_cast %14 : vector<8x128xf32> to vector<1x8x128xf32>
      tpu.vector_store %arg6[%c0_13, %c0_14, %c0_15], %17 {strides = array<i32>} : memref<1x8x128xf32, #tpu.memory_space<vmem>>, vector<1x8x128xf32>,
    } else {
    }
    %c0 = arith.constant 0 : index
    %c0_1 = arith.constant 0 : index
    %c0_2 = arith.constant 0 : index
    %3 = vector.load %arg6[%c0, %c0_1, %c0_2] : memref<1x8x128xf32, #tpu.memory_space<vmem>>, vector<1x8x128xf32>
    %4 = vector.shape_cast %3 : vector<1x8x128xf32> to vector<8x128xf32>
    %c0_3 = arith.constant 0 : index
    %c0_4 = arith.constant 0 : index
    %c0_5 = arith.constant 0 : index
    %5 = vector.load %arg4[%c0_3, %c0_4, %c0_5] : memref<1x8x128xf32, #tpu.memory_space<vmem>>, vector<1x8x128xf32>
    %6 = vector.shape_cast %5 : vector<1x8x128xf32> to vector<8x128xf32>
    %c0_6 = arith.constant 0 : index
    %c0_7 = arith.constant 0 : index
    %c0_8 = arith.constant 0 : index
    %7 = vector.load %arg5[%c0_6, %c0_7, %c0_8] : memref<1x128x128xf32, #tpu.memory_space<vmem>>, vector<1x128x128xf32>
    %8 = vector.shape_cast %7 : vector<1x128x128xf32> to vector<128x128xf32>
    %cst = arith.constant dense<0.000000e+00> : vector<8x128xf32>
    %9 = tpu.matmul %6, %8, %cst {dimension_numbers = #tpu.dot_dimension_numbers<[1], [0], [0], [1], [0, 0, 1, 1], [], []>} : vector<8x128xf32>, vector<128x128xf32>, vector<8x128xf32> -> vector<8x128xf32>
    %10 = arith.addf %4, %9 : vector<8x128xf32>
    %c0_9 = arith.constant 0 : index
    %c0_10 = arith.constant 0 : index
    %c0_11 = arith.constant 0 : index
    %11 = vector.load %arg6[%c0_9, %c0_10, %c0_11] : memref<1x8x128xf32, #tpu.memory_space<vmem>>, vector<1x8x128xf32>
    %12 = vector.shape_cast %11 : vector<1x8x128xf32> to vector<8x128xf32>
    %13 = vector.shape_cast %10 : vector<8x128xf32> to vector<1x8x128xf32>
    tpu.vector_store %arg6[%c0_9, %c0_10, %c0_11], %13 {strides = array<i32>} : memref<1x8x128xf32, #tpu.memory_space<vmem>>, vector<1x8x128xf32>,
    return
  }
  func.func @transform_0(%arg0: i32, %arg1: i32, %arg2: i32, %arg3: i32) -> (i32, i32, i32) {
    %c0_i32 = arith.constant 0 : i32
    return %arg0, %arg1, %arg3 : i32, i32, i32
  }
  func.func @transform_1(%arg0: i32, %arg1: i32, %arg2: i32, %arg3: i32) -> (i32, i32, i32) {
    %c0_i32 = arith.constant 0 : i32
    return %arg0, %arg3, %arg2 : i32, i32, i32
  }
  func.func @transform_2(%arg0: i32, %arg1: i32, %arg2: i32, %arg3: i32) -> (i32, i32, i32) {
    %c0_i32 = arith.constant 0 : i32
    return %arg0, %arg1, %arg2 : i32, i32, i32
  }
}

</mosaic_0001>

<bundles_post_ra>
// kernel: tpu_custom_call.1
= control target key start
LH: loop header
LB: loop body
LE: loop exit
PB: predicated region body
PF: predicated region fallthrough
CT: control target
= control target key end

     0   :  { %7 = vsyncpa [#allocation3], 0  ;;  %s800_s0 = inlined_call_operand.vmem [shape: f32[2,8,128], index: 0, kind: input, shape index: {}]   ;;  %s801_s1 = inlined_call_operand.vmem [shape: f32[2,128,16], index: 1, kind: input, shape index: {}]   ;;  %s802_s2 = inlined_call_operand.hbm [shape: f32[2,8,16], index: 2, kind: output, shape index: {}]  }
   0x1   :  { %9 = vsyncpa [#allocation3 + $0x1], 0  ;;  %s670_s9 = smov 0   ;;  %s672_s10 = smov 0  }
   0x2   :  { %s674_s11 = smov 0   ;;  %s676_s12 = smov 0  }
   0x3   :  { %s678_s13 = smov 0   ;;  %s680_s14 = smov 0  }
   0x4 LB: > { %s451_s15 = sadd.s32 4294967295, %s650_s14   ;;  %s452_s16 = sadd.s32 4294967294, %s650_s14   ;;  %s650_s14 = sphi %s680_s14, %s15_s14   ;;  %s646_s13 = sphi %s678_s13, %s809_s13   ;;  %s642_s12 = sphi %s676_s12, %s808_s12   ;;  %s638_s11 = sphi %s674_s11, %s807_s11   ;;  %s634_s10 = sphi %s672_s10, %s806_s10   ;;  %s630_s9 = sphi %s670_s9, %s805_s9  }
   0x5   : > { %s41_s17 = sadd.s32 1, %s646_s13  ;;  %s112_s18 = sadd.s32 1, %s638_s11 }
   0x6   : > { %p43_p0 = scmp.ge.s32.totalorder %s41_s17, 2  ;;  %p122_p1 = scmp.ne.s32.totalorder %s638_s11, %s634_s10 }
   0x7   : > { %p123_p2 = scmp.eq.s32.totalorder %s451_s15, 1  ;;  %p128_p3 = scmp.ne.s32.totalorder %s634_s10, %s630_s9 }
   0x8   : > { %s811_s17 = smov (%p43_p0, %s41_s17), 0  ;;  %p129_p5 = scmp.eq.s32.totalorder %s452_s16, 1 }
   0x9   : > { %p710_p4 = por %p123_p2, %p122_p1  ;;  %s105_s20 = ssub.s32 %s646_s13, %s811_s17 }
   0xa   : > { %p455_p6 = scmp.ge.s32.totalorder %s650_s14, 1  ;;  %p110_p7 = scmp.eq.s32.totalorder %s105_s20, 0 }
   0xb   : > { %p717_p8 = por %p129_p5, %p128_p3  ;;  %p176_p9 = scmp.lt.s32.totalorder %s650_s14, 3 }
   0xc   : > { %s723_s22 = scalar_select %p110_p7, %s638_s11, %s112_s18  }
   0xd   : > { %p177_p10 = pnand %p455_p6, %p176_p9 }
   0xe   : > { %p215_p11 = scmp.lt.s32.totalorder (!%p177_p10), %s642_s12, 1  ;;  %s212_s4 = sand.u32 (!%p177_p10), 1, %s634_s10  }
   0xf   : > { %180 = sbr.rel (%p177_p10) target bundleno = 263 (0x107), region = 28  ;;  %s456_s5 = sshll.u32 (!%p177_p10), %s212_s4, 3 }
  0x10   : > { %s461_s6 = sshll.u32 (!%p177_p10), %s642_s12, 7  ;;  %s214_s7 = scalar_lea.vmem (!%p177_p10), [#allocation2], %s456_s5 }
  0x11   : > { %s349_s8 = sshll.u32 (!%p177_p10), %s214_s7, 4  ;;  %s760_s18 = scalar_lea.hbm (!%p177_p10), %s802_s2, %s461_s6  ;;  %s350_s8 = int_to_ptr.vmem [resolvable:$true] %s349_s8 }
  0x12   : > { %s334_s20 = scalar_lea.sflag (!%p177_p10), [#allocation3], %s212_s4 }
  0x14   : > { %v652_v0 = vmov 0.0   ;;  %vm653_vm0 = vmmov 0   ;;  %s727_s23 = scalar_select %p215_p11, %s642_s12, 1 }
  0x15   : > { %482 = vmatprep.subr.mxu0 %v652_v0  ;;  %514 = vmatprep.mubr.msk.f32.mxu0 %vm653_vm0, %v652_v0 }
  0x16   : > { %s464_s24 = sshll.u32 %s727_s23, 7  ;;  %s457_s28 = sshll.u32 %s727_s23, 3 }
  0x17   : > { %s733_s27 = scalar_lea.vmem %s801_s1, %s464_s24  ;;  %s224_s3 = scalar_lea.vmem %s800_s0, %s457_s28 }
  0x18   : > { %v260_v1 = vld [vmem:[%s733_s27 + $0x78] sm:$0xff]  ;;  %v259_v2 = vld [vmem:[%s733_s27 + $0x70] sm:$0xff]  ;;  %v258_v3 = vld [vmem:[%s733_s27 + $0x68] sm:$0xff]  ;;  %s574_s23 = scalar_lea.vmem %s350_s8, 128  ;;  %s654_s24 = smov [#allocation2]  }
  0x19   : > { %483 = vmatpush3.msra.mxu0 %v260_v1  ;;  %v257_v4 = vld [vmem:[%s733_s27 + $0x60] sm:$0xff]  ;;  %v256_v5 = vld [vmem:[%s733_s27 + $0x58] sm:$0xff]  ;;  %v255_v6 = vld [vmem:[%s733_s27 + $0x50] sm:$0xff]  ;;  %p575_p12 = scmp.ne.s32.totalorder %s350_s8, %s574_s23  ;;  %s578_s25 = sshll.u32 %s654_s24, 4  ;;  %s579_s25 = int_to_ptr.vmem [resolvable:$false] %s578_s25 }
  0x1a   : > { %484 = vmatprep.subr.mxu0 %v652_v0  ;;  %v254_v7 = vld [vmem:[%s733_s27 + $0x48] sm:$0xff]  ;;  %v253_v8 = vld [vmem:[%s733_s27 + $0x40] sm:$0xff]  ;;  %v252_v9 = vld [vmem:[%s733_s27 + $0x38] sm:$0xff]  ;;  %s580_s12 = scalar_lea.vmem %s579_s25, 256  ;;  %p581_p1 = scmp.lt.s32.totalorder %s350_s8, %s579_s25 }
  0x1b   : > { %485 = vmatpush3.msra.mxu0 %v259_v2  ;;  %v251_v10 = vld [vmem:[%s733_s27 + $0x30] sm:$0xff]  ;;  %v250_v11 = vld [vmem:[%s733_s27 + $0x28] sm:$0xff]  ;;  %v249_v12 = vld [vmem:[%s733_s27 + $0x20] sm:$0xff]  ;;  %p576_p13 = pnand %p575_p12, %p710_p4  ;;  %p582_p2 = scmp.lt.s32.totalorder %s580_s12, %s574_s23 }
  0x1c   : > { %486 = vmatprep.subr.mxu0 %v652_v0  ;;  %v248_v13 = vld [vmem:[%s733_s27 + $0x18] sm:$0xff]  ;;  %v247_v14 = vld [vmem:[%s733_s27 + $0x10] sm:$0xff]  ;;  %v246_v15 = vld [vmem:[%s733_s27 + $0x8] sm:$0xff] }
  0x1d   : > { %487 = vmatpush3.msra.mxu0 %v258_v3  ;;  %v245_v16 = vld [vmem:[%s733_s27] sm:$0xff]  ;;  %p577_p0 = pneg %p576_p13  ;;  %p583_p3 = por %p582_p2, %p581_p1 }
  0x1e   : > { %488 = vmatprep.subr.mxu0 %v652_v0  ;;  %v244_v17 = vld [vmem:[%s224_s3] sm:$0xff] }
  0x1f   : > { %489 = vmatpush3.msra.mxu0 %v257_v4  ;;  %p584_p5 = pnand %p583_p3, %p577_p0 }
  0x20   : > { %490 = vmatprep.subr.mxu0 %v652_v0 }
  0x21   : > { %491 = vmatpush3.msra.mxu0 %v256_v5 }
  0x22   : > { %492 = vmatprep.subr.mxu0 %v652_v0 }
  0x23   : > { %493 = vmatpush3.msra.mxu0 %v255_v6 }
  0x24   : > { %494 = vmatprep.subr.mxu0 %v652_v0 }
  0x25   : > { %495 = vmatpush3.msra.mxu0 %v254_v7 }
  0x26   : > { %496 = vmatprep.subr.mxu0 %v652_v0 }
  0x27   : > { %497 = vmatpush3.msra.mxu0 %v253_v8 }
  0x28   : > { %498 = vmatprep.subr.mxu0 %v652_v0 }
  0x29   : > { %499 = vmatpush3.msra.mxu0 %v252_v9 }
  0x2a   : > { %500 = vmatprep.subr.mxu0 %v652_v0 }
  0x2b   : > { %501 = vmatpush3.msra.mxu0 %v251_v10 }
  0x2c   : > { %502 = vmatprep.subr.mxu0 %v652_v0 }
  0x2d   : > { %503 = vmatpush3.msra.mxu0 %v250_v11 }
  0x2e   : > { %504 = vmatprep.subr.mxu0 %v652_v0 }
  0x2f   : > { %505 = vmatpush3.msra.mxu0 %v249_v12 }
  0x30   : > { %506 = vmatprep.subr.mxu0 %v652_v0 }
  0x31   : > { %507 = vmatpush3.msra.mxu0 %v248_v13 }
  0x32   : > { %508 = vmatprep.subr.mxu0 %v652_v0 }
  0x33   : > { %509 = vmatpush3.msra.mxu0 %v247_v14 }
  0x34   : > { %510 = vmatprep.subr.mxu0 %v652_v0 }
  0x35   : > { %511 = vmatpush3.msra.mxu0 %v246_v15 }
  0x36   : > { %512 = vmatprep.subr.mxu0 %v652_v0 }
  0x37   : > { %513 = vmatpush3.msra.mxu0 %v245_v16 }
  0x38   : > { %515 = vmatmul.mubr.f32.vlgmr.msra.gmra.mxu0 %v244_v17 }
  0xf8   : > { %v327_v18 = vpop.f32.mrf.mxu0 }
  0xf9   : > { %332 = vst [vmem:[%s214_s7] sm:$0xff] %v327_v18 }
  0xfa   : > { %v516_v19 = vpop.f32.mrf.mxu0 }
  0xfb   : > { %587 = shalt.err (!%p584_p5)
}
  0xfc   : > { %s588_s26 = scalar_lea.hbm %s760_s18, 128  ;;  %s592_s29 = scalar_lea.hbm %s802_s2, 256 }
  0xfd   : > { %p589_p6 = scmp.ne.s32.totalorder %s760_s18, %s588_s26  ;;  %p593_p10 = scmp.lt.s32.totalorder %s760_s18, %s802_s2 }
  0xfe   : > { %p594_p11 = scmp.lt.s32.totalorder %s592_s29, %s588_s26 }
  0xff   : > { %p590_p7 = pnand %p589_p6, %p710_p4 }
 0x100   : > { %p595_p12 = por %p594_p11, %p593_p10 }
 0x101   : > { %p591_p9 = pneg %p590_p7 }
 0x103   : > { %p596_p13 = pnand %p595_p12, %p591_p9 }
 0x105   : > { %599 = shalt.err (!%p596_p13)
}
 0x106   : > { %517 = dma.vmem_to_hbm [thread:$0]  (%p710_p4), %s350_s8, 128, %s760_s18, %s334_s20  }
 0x107 PF: > { %p523_p0 = scmp.ge.s32.totalorder %s650_s14, 2  ;;  %s361_s4 = sand.u32 1, %s630_s9  }
 0x108   : > { %s362_s5 = scalar_lea.sflag [#allocation3], %s361_s4 }
 0x109   : > { %p520_p1 = pnand %p523_p0, %p717_p8 }
 0x10b   : > { %p521_p2 = pneg %p520_p1 }
 0x10d   : > { %625 = dma.done.wait (%p521_p2), %s362_s5, 128  }
 0x10e   : > { %627 = vsyncadd (%p521_p2), %s362_s5, 4294967168  ;;  %s15_s14 = sadd.s32 1, %s650_s14   ;;  %s805_s9 = smov %s634_s10 }
 0x10f   : > { %p12_p3 = scmp.ge.s32.totalorder %s15_s14, 4   ;;  %s806_s10 = smov %s638_s11 }
 0x110   : > { %s807_s11 = smov %s723_s22  ;;  %s808_s12 = smov %s646_s13 }
 0x111   : > { %s809_s13 = smov %s811_s17  ;;  %14 = sbr.rel (!%p12_p3) target bundleno = 4 (0x4), region = 70 }
 0x116   :  { %367 = vsyncpa [#allocation3], 1 }
 0x117   :  { %369 = vsyncpa [#allocation3 + $0x1], 1 }

</bundles_post_ra>
